<compile_context>
chip_gen: v7x
topology: tpu7x:2x2x1
jax: 0.10.0
libtpu: 0.0.40
codegen_flags: <defaults>
</compile_context>

<pallas_src>
import functools
import math

import jax
import jax.numpy as jnp
from jax.experimental import pallas as pl
from jax.experimental.pallas import tpu as pltpu


# ----------------------------- kernel body --------------------------------- #

def _rmsnorm_kernel(x_ref, w_ref, o_ref, *, eps: float):
    # x_ref: (row_tile, dim) block; w_ref: (1, dim) weight block (resident).
    x = x_ref[...].astype(jnp.float32)                 # x = x.float()
    var = jnp.mean(x * x, axis=-1, keepdims=True)      # pow(2).mean(-1)  -> XLU
    inv = jax.lax.rsqrt(var + eps)                     # rsqrt(var + eps) -> EUP
    y = x * inv * w_ref[...].astype(jnp.float32)       # scale            -> VPU
    o_ref[...] = y.astype(o_ref.dtype)                 # .type_as(weight)


# ----------------------------- helpers ------------------------------------- #

def _sublane_multiple(dtype) -> int:
    # f32 -> 8 sublanes/vreg, bf16 -> 16, int8/fp8 -> 32 (packed dtypes).
    itemsize = jnp.dtype(dtype).itemsize
    return max(8, 32 // max(1, itemsize))


def _vmem_capacity_bytes() -> int:
    # Per-TensorCore VMEM; conservative fallback = v7x's 64 MiB per TC.
    try:
        return int(pltpu.get_tpu_info().vmem_capacity_bytes)
    except Exception:
        return 64 * 1024 * 1024


def _pick_row_tile(rows: int, dim: int, x_dtype, out_dtype) -> int:
    """Largest aligned row tile s.t. double-buffered in/out tiles plus the f32
    in-kernel intermediate fit comfortably in per-core VMEM."""
    sub = max(_sublane_multiple(x_dtype), _sublane_multiple(out_dtype))
    if rows <= sub:
        return rows  # full-extent block satisfies the (8,128) rule directly

    in_row = dim * jnp.dtype(x_dtype).itemsize
    out_row = dim * jnp.dtype(out_dtype).itemsize
    f32_row = dim * 4
    # 2x double-buffered in + out tiles, plus ~2x the f32 intermediate the
    # kernel materializes when upcasting the whole block.
    per_row = 2 * (in_row + out_row) + 2 * f32_row
    budget = int(_vmem_capacity_bytes() * 0.35)

    tile = budget // max(1, per_row)
    tile = min(tile, 512, rows)              # roofline saturates by ~512 rows
    if rows >= 8 * sub:
        # Keep the grid >= ~8 steps so each v7x TensorCore gets >= 4 steps and
        # the pipeline actually double-buffers (per-step overhead ~0.35 us).
        tile = min(tile, pl.cdiv(rows, 8))
    tile = max(sub, (tile // sub) * sub)     # sublane-align
    return tile


def _rmsnorm_xla(x: jax.Array, weight: jax.Array, eps: float) -> jax.Array:
    # Fallback for lane-sparse hidden dims (dim % 128 != 0): fused XLA wins.
    xf = x.astype(jnp.float32)
    var = jnp.mean(xf * xf, axis=-1, keepdims=True)
    y = xf * jax.lax.rsqrt(var + eps) * weight.astype(jnp.float32)
    return y.astype(weight.dtype)


# ----------------------------- wrapper -------------------------------------- #

def rmsnorm(x: jax.Array, weight: jax.Array, eps: float = 1e-5,
            row_tile: int | None = None) -> jax.Array:
    """RMSNorm over the last dim. x: (..., dim), weight: (dim,).
    Output dtype == weight.dtype (matches `(x * weight).type_as(weight)`)."""
    orig_shape = x.shape
    dim = orig_shape[-1]
    assert weight.shape == (dim,)
    out_dtype = weight.dtype

    # Lane-density guard: sub-128 / non-multiple-of-128 last dims mean masked
    # partial stores and lane-sparse DMA — hand those to XLA instead.
    if dim % 128 != 0:
        return _rmsnorm_xla(x, weight, eps)

    rows = int(math.prod(orig_shape[:-1])) if len(orig_shape) > 1 else 1
    rows = max(rows, 1)
    x2d = x.reshape(rows, dim)
    w2d = weight.reshape(1, dim)

    if row_tile is None:
        row_tile = _pick_row_tile(rows, dim, x.dtype, out_dtype)
    row_tile = max(1, min(row_tile, rows)) if rows < 8 else row_tile

    # Ragged rows: NO wrapper pad/slice. cdiv grid + Pallas-masked boundary
    # block; the reduction is per-row so garbage rows in the partial block
    # never affect valid rows and are never stored.
    grid_rows = pl.cdiv(rows, row_tile)

    in_tile_bytes = row_tile * dim * jnp.dtype(x.dtype).itemsize
    out_tile_bytes = row_tile * dim * jnp.dtype(out_dtype).itemsize
    f32_tile_bytes = row_tile * dim * 4
    w_bytes = dim * jnp.dtype(weight.dtype).itemsize
    # Double-buffered in/out tiles + weight + 2x f32 intermediate + headroom;
    # cap the request so it composes with other VMEM users in a larger jit.
    vmem_limit = (2 * (in_tile_bytes + out_tile_bytes) + 2 * w_bytes
                  + 2 * f32_tile_bytes + (4 << 20))
    vmem_limit = int(min(max(vmem_limit, 16 << 20),
                         _vmem_capacity_bytes(), 100 << 20))

    cost = pl.CostEstimate(
        flops=4 * rows * dim,                 # square, reduce-add, 2x scale
        transcendentals=rows,                 # one rsqrt per row
        bytes_accessed=rows * dim * (jnp.dtype(x.dtype).itemsize
                                     + jnp.dtype(out_dtype).itemsize) + w_bytes,
    )

    out2d = pl.pallas_call(
        functools.partial(_rmsnorm_kernel, eps=eps),
        out_shape=jax.ShapeDtypeStruct((rows, dim), out_dtype),
        grid_spec=pltpu.PrefetchScalarGridSpec(
            num_scalar_prefetch=0,
            grid=(grid_rows,),
            in_specs=[
                pl.BlockSpec((row_tile, dim), lambda i: (i, 0)),   # x row tile
                pl.BlockSpec((1, dim), lambda i: (0, 0)),          # weight (resident)
            ],
            out_specs=pl.BlockSpec((row_tile, dim), lambda i: (i, 0)),
        ),
        compiler_params=pltpu.CompilerParams(
            dimension_semantics=("parallel",),   # shard rows across TCs on v7x
            vmem_limit_bytes=vmem_limit,
        ),
        cost_estimate=cost,
    )(x2d, w2d)

    return out2d.reshape(orig_shape[:-1] + (dim,))


# ----------------------------- reference + tests ---------------------------- #

def _ref(x, weight, eps):
    xf = x.astype(jnp.float32)
    var = jnp.mean(xf * xf, axis=-1, keepdims=True)
    return (xf * jax.lax.rsqrt(var + eps) * weight.astype(jnp.float32)).astype(weight.dtype)


if __name__ == "__main__":
    eps = 1e-5
    key = jax.random.PRNGKey(0)

    # Main case: lane-dense hidden dim so the Pallas path runs.
    batch, seq, hidden = 2, 8, 128
    x = jax.random.normal(key, (batch, seq, hidden), dtype=jnp.float32)
    weight = jnp.ones((hidden,), dtype=jnp.float32)   # nn.Parameter(torch.ones(dim))

    out = jax.block_until_ready(rmsnorm(x, weight, eps=eps))
    assert out.shape == (batch, seq, hidden)
    assert out.dtype == weight.dtype
    assert jnp.allclose(out, _ref(x, weight, eps), atol=1e-5, rtol=1e-5)

    # Ragged rows (rows not divisible by the sublane-aligned tile): exercises
    # the pad-free cdiv boundary-block path.
    x_r = jax.random.normal(jax.random.PRNGKey(1), (3, 5, hidden), jnp.float32)
    out_r = jax.block_until_ready(rmsnorm(x_r, weight, eps=eps))
    assert jnp.allclose(out_r, _ref(x_r, weight, eps), atol=1e-5, rtol=1e-5)

    # bf16 case with a multi-step grid (pipelined double-buffering).
    hb = 256
    xb = jax.random.normal(jax.random.PRNGKey(2), (4, 64, hb), jnp.bfloat16)
    wb = jnp.ones((hb,), dtype=jnp.bfloat16)
    out_b = jax.block_until_ready(rmsnorm(xb, wb, eps=eps))
    assert out_b.dtype == jnp.bfloat16
    assert jnp.allclose(out_b.astype(jnp.float32),
                        _ref(xb, wb, eps).astype(jnp.float32),
                        atol=2e-2, rtol=2e-2)

    # Lane-sparse hidden dim (32): falls back to fused XLA, same semantics.
    x_s = jax.random.normal(jax.random.PRNGKey(3), (2, 8, 32), jnp.float32)
    w_s = jnp.ones((32,), dtype=jnp.float32)
    out_s = jax.block_until_ready(rmsnorm(x_s, w_s, eps=eps))
    assert jnp.allclose(out_s, _ref(x_s, w_s, eps), atol=1e-5, rtol=1e-5)

    print("KERNEL_OK")
</pallas_src>

<mosaic_0001>
module attributes {stable_mosaic.version = 11 : i64} {
  func.func @_rmsnorm_kernel(%arg0: i32, %arg1: memref<16x128xf32, #tpu.memory_space<vmem>>, %arg2: memref<1x128xf32, #tpu.memory_space<vmem>>, %arg3: memref<16x128xf32, #tpu.memory_space<vmem>>) attributes {dimension_semantics = [#tpu.dimension_semantics<parallel>], iteration_bounds = array<i64: 1>, scalar_prefetch = 0 : i64, scratch_operands = 0 : i64, tpu.core_type = #tpu.core_type<tc>, window_params = [{transform_indices = @transform_0, window_bounds = array<i64: 16, 128>}, {pipeline_mode = #tpu.pipeline_mode<synchronous>, transform_indices = @transform_1, window_bounds = array<i64: 1, 128>}, {transform_indices = @transform_2, window_bounds = array<i64: 16, 128>}]} {
    %c0 = arith.constant 0 : index
    %c0_0 = arith.constant 0 : index
    %0 = vector.load %arg1[%c0, %c0_0] : memref<16x128xf32, #tpu.memory_space<vmem>>, vector<16x128xf32>
    %1 = arith.mulf %0, %0 : vector<16x128xf32>
    %cst = arith.constant dense<0.000000e+00> : vector<16xf32>
    %2 = vector.multi_reduction <add>, %1, %cst [1] : vector<16x128xf32> to vector<16xf32>
    %3 = vector.shape_cast %2 : vector<16xf32> to vector<16x1xf32>
    %cst_1 = arith.constant 1.280000e+02 : f32
    %4 = vector.broadcast %cst_1 : f32 to vector<16x1xf32>
    %5 = arith.divf %3, %4 : vector<16x1xf32>
    %cst_2 = arith.constant 9.99999974E-6 : f32
    %6 = vector.broadcast %cst_2 : f32 to vector<16x1xf32>
    %7 = arith.addf %5, %6 : vector<16x1xf32>
    %8 = math.rsqrt %7 : vector<16x1xf32>
    %9 = vector.broadcast %8 : vector<16x1xf32> to vector<16x128xf32>
    %10 = arith.mulf %0, %9 : vector<16x128xf32>
    %c0_3 = arith.constant 0 : index
    %c0_4 = arith.constant 0 : index
    %11 = vector.load %arg2[%c0_3, %c0_4] : memref<1x128xf32, #tpu.memory_space<vmem>>, vector<1x128xf32>
    %12 = vector.broadcast %11 : vector<1x128xf32> to vector<16x128xf32>
    %13 = arith.mulf %10, %12 : vector<16x128xf32>
    %c0_5 = arith.constant 0 : index
    %c0_6 = arith.constant 0 : index
    %14 = vector.load %arg3[%c0_5, %c0_6] : memref<16x128xf32, #tpu.memory_space<vmem>>, vector<16x128xf32>
    tpu.vector_store %arg3[%c0_5, %c0_6], %13 {strides = array<i32>} : memref<16x128xf32, #tpu.memory_space<vmem>>, vector<16x128xf32>,
    return
  }
  func.func @transform_0(%arg0: i32) -> (i32, i32) {
    %c0_i32 = arith.constant 0 : i32
    %c0_i32_0 = arith.constant 0 : i32
    return %arg0, %c0_i32 : i32, i32
  }
  func.func @transform_1(%arg0: i32) -> (i32, i32) {
    %c0_i32 = arith.constant 0 : i32
    %c0_i32_0 = arith.constant 0 : i32
    %c0_i32_1 = arith.constant 0 : i32
    return %c0_i32, %c0_i32_0 : i32, i32
  }
  func.func @transform_2(%arg0: i32) -> (i32, i32) {
    %c0_i32 = arith.constant 0 : i32
    %c0_i32_0 = arith.constant 0 : i32
    return %arg0, %c0_i32 : i32, i32
  }
}

</mosaic_0001>

<bundles_post_ra>
// kernel: tpu_custom_call.1
= control target key start
LH: loop header
LB: loop body
LE: loop exit
PB: predicated region body
PF: predicated region fallthrough
CT: control target
= control target key end

     0   :  { %7 = vsyncpa [#allocation3], 0  ;;  %s180_s0 = inlined_call_operand.hbm [shape: f32[16,128], index: 0, kind: input, shape index: {}]   ;;  %s181_s1 = inlined_call_operand.vmem [shape: f32[1,128], index: 1, kind: input, shape index: {}]   ;;  %s182_s2 = inlined_call_operand.hbm [shape: f32[16,128], index: 2, kind: output, shape index: {}]  }
   0x1   :  { %8 = vsyncpa [#allocation4], 0  ;;  %s128_s9 = smov [#allocation2]   ;;  %s80_s13 = scalar_lea.hbm %s180_s0, 256 }
   0x2   :  { %s14_s10 = sshll.u32 %s128_s9, 4  ;;  %p81_p0 = scmp.ne.s32.totalorder %s180_s0, %s80_s13  ;;  %s15_s10 = int_to_ptr.vmem [resolvable:$true] %s14_s10 }
   0x3   :  { %p84_p1 = scmp.lt.u32.totalorder %s80_s13, %s180_s0 }
   0x5   :  { %p86_p2 = pnand %p84_p1, %p81_p0 }
   0x7   :  { %89 = shalt.err (!%p86_p2)
}
   0x8   :  { %s90_s18 = scalar_lea.vmem %s15_s10, 256  ;;  %p95_p4 = scmp.lt.s32.totalorder %s15_s10, %s15_s10 }
   0x9   :  { %p91_p3 = scmp.ne.s32.totalorder %s15_s10, %s90_s18  ;;  %p96_p5 = scmp.lt.s32.totalorder %s90_s18, %s90_s18 }
   0xb   :  { %p97_p6 = por %p96_p5, %p95_p4 }
   0xd   :  { %p98_p7 = pnand %p97_p6, %p91_p3 }
   0xf   :  { %101 = shalt.err (!%p98_p7)
}
  0x10   :  { %s129_s19 = smov 128   ;;  %s130_s20 = smov 8  }
  0x11   :  { %20 = dma.hbm_to_vmem [thread:$0]  %s180_s0, 256, %s15_s10, [#allocation3], %s129_s19, %s129_s19, %s130_s20  }
  0x12   :  { %124 = dma.done.wait [#allocation3], 256  }
  0x13   :  { %125 = vsyncadd [#allocation3], 4294967040  ;;  %v26_v0 = vld [vmem:[#allocation2] sm:$0xff]  ;;  %v27_v1 = vld [vmem:[#allocation2 + $0x8] sm:$0xff]  ;;  %s131_s0 = smov [#allocation5]  }
  0x14   :  { %v28_v2 = vmul.f32 %v26_v0, %v26_v0  ;;  %v29_v3 = vmul.f32 %v27_v1, %v27_v1  ;;  %v71_v11 = vld [vmem:[%s181_s1] ss:$0 sm:$0xff]  ;;  %s59_s25 = sshll.u32 %s131_s0, 4  ;;  %s60_s25 = int_to_ptr.vmem [resolvable:$true] %s59_s25 }
  0x15   :  { %s102_s26 = scalar_lea.vmem %s60_s25, 256  ;;  %p107_p9 = scmp.lt.s32.totalorder %s60_s25, %s60_s25 }
  0x16   :  { %30 = vadd.xlane.f32.xlu0 %v28_v2  ;;  %p103_p8 = scmp.ne.s32.totalorder %s60_s25, %s102_s26  ;;  %p108_p10 = scmp.lt.s32.totalorder %s102_s26, %s102_s26 }
  0x18   :  { %p109_p11 = por %p108_p10, %p107_p9 }
  0x1a   :  { %32 = vadd.xlane.f32.xlu0 %v29_v3  ;;  %p110_p12 = pnand %p109_p11, %p103_p8 }
  0xa3   :  { %v31_v4 = vpop.xlane.xlu0 %30 }
  0xa4   :  { %v35_v5 = vmul.f32 0.0078125, %v31_v4 }
  0xa6   :  { %v37_v6 = vadd.f32 1e-05, %v35_v5 }
  0xa7   :  { %v33_v7 = vpop.xlane.xlu0 %32 }
  0xa8   :  { %76 = vrsqrt.f32 %v37_v6  ;;  %v36_v8 = vmul.f32 0.0078125, %v33_v7 }
  0xaa   :  { %v38_v9 = vadd.f32 1e-05, %v36_v8 }
  0xac   :  { %78 = vrsqrt.f32 %v38_v9 }
  0xb2   :  { %v77_v10 = vpop.eup %76 }
  0xb3   :  { %v41_v12 = vmul.f32 %v77_v10, %v26_v0 }
  0xb5   :  { %v50_v13 = vmul.f32 %v71_v11, %v41_v12 }
  0xb6   :  { %v79_v14 = vpop.eup %78 }
  0xb7   :  { %v42_v15 = vmul.f32 %v79_v14, %v27_v1  ;;  %52 = vst [vmem:[#allocation5] sm:$0xff] %v50_v13 }
  0xb9   :  { %v51_v16 = vmul.f32 %v71_v11, %v42_v15 }
  0xbb   :  { %53 = vst [vmem:[#allocation5 + $0x8] sm:$0xff] %v51_v16 }
  0xbc   :  { %113 = shalt.err (!%p110_p12)
}
  0xbd   :  { %s114_s1 = scalar_lea.hbm %s182_s2, 256 }
  0xbe   :  { %p115_p13 = scmp.ne.s32.totalorder %s182_s2, %s114_s1  ;;  %p118_p0 = scmp.lt.u32.totalorder %s114_s1, %s182_s2 }
  0xc0   :  { %p120_p1 = pnand %p118_p0, %p115_p13 }
  0xc2   :  { %123 = shalt.err (!%p120_p1)
}
  0xc3   :  { %65 = dma.vmem_to_hbm [thread:$0]  %s60_s25, 256, %s182_s2, [#allocation4], %s129_s19, %s129_s19, %s130_s20  }
  0xc4   :  { %126 = dma.done.wait [#allocation4], 256  }
  0xc5   :  { %127 = vsyncadd [#allocation4], 4294967040 }
  0xc6   :  { %69 = vsyncpa [#allocation3], 1 }
  0xc7   :  { %70 = vsyncpa [#allocation4], 1 }

</bundles_post_ra>
